<compile_context>
chip_gen: v7x
topology: tpu7x:2x2x1
jax: 0.10.0
libtpu: 0.0.40
codegen_flags: <defaults>
</compile_context>

<pallas_src>
import functools

import jax
import jax.numpy as jnp
from jax import lax
from jax.experimental import pallas as pl
from jax.experimental.pallas import tpu as pltpu


def _ge2e_fusion_kernel(bs, x_ref, params_ref, out_ref):
    """One grid step handles `bs` query speakers against all N centroids.

    x_ref      : (N, M, Dp) f32 in VMEM (whole tensor, resident across grid)
    params_ref : (4,) f32 in SMEM = (w_softmax, b_softmax, w_contrast, b_contrast)
    out_ref    : (1, 8, 128) f32 partial tile:
                 [0,0,0]=sum softmax loss, [0,0,1]=sum contrast loss, [0,0,2]=#correct
    """
    N, M, Dp = x_ref.shape
    w_s = params_ref[0]
    b_s = params_ref[1]
    w_c = params_ref[2]
    b_c = params_ref[3]

    blk = pl.program_id(0)
    start = blk * bs
    x = x_ref[pl.ds(start, bs)]                       # (bs, M, Dp) query block

    # --- centroids over all speakers (x stays resident, recompute is trivial) ---
    x_full = x_ref[...]
    sums_full = jnp.sum(x_full, axis=1)               # (N, Dp)
    centroids = sums_full * (1.0 / M)                 # (N, Dp)
    c_inorm = lax.rsqrt(jnp.sum(centroids * centroids, axis=-1))     # (N,)

    # --- block statistics ---
    x_sq = jnp.sum(x * x, axis=-1)                    # (bs, M)
    x_inorm = lax.rsqrt(x_sq)                         # (bs, M)
    sums_blk = jnp.sum(x, axis=1)                     # (bs, Dp)
    sums_blk_sq = jnp.sum(sums_blk * sums_blk, axis=-1)               # (bs,)

    # --- MXU: dot(x, centroid_k) for all k, contracting trailing (lane) dims ---
    x2d = x.reshape(bs * M, Dp)
    dots = lax.dot_general(
        x2d, centroids,
        dimension_numbers=(((1,), (1,)), ((), ())),
        preferred_element_type=jnp.float32,
    ).reshape(bs, M, N)                               # (bs, M, N)

    # --- diagonal mask / global speaker ids (built once, reused) ---
    k_idx = lax.broadcasted_iota(jnp.int32, (bs, M, N), 2)
    spk = lax.broadcasted_iota(jnp.int32, (bs, M), 0) + start         # (bs, M)
    is_diag = k_idx == spk[:, :, None]

    # --- leave-one-out self similarity, derived algebraically (no excl tensor):
    #   x . sums[j]          = M * dots_diag
    #   (M-1)^2 ||excl||^2   = ||sums[j]||^2 - 2 M dots_diag + ||x||^2
    #   cos_self = (M dots_diag - ||x||^2) * x_inorm
    #              * rsqrt(||sums[j]||^2 - 2 M dots_diag + ||x||^2)
    xs_dot = M * jnp.sum(jnp.where(is_diag, dots, 0.0), axis=-1)      # (bs, M)
    e_sq = jnp.maximum(sums_blk_sq[:, None] - 2.0 * xs_dot + x_sq, 1e-12)
    cos_self = (xs_dot - x_sq) * x_inorm * lax.rsqrt(e_sq)            # (bs, M)
    cos_self = jnp.maximum(cos_self, 1e-6)            # torch.clamp(cos, 1e-6) on diag

    # --- cosine matrix with diagonal replaced by exclusive-centroid term ---
    cos_off = dots * x_inorm[:, :, None] * c_inorm[None, None, :]
    cos = jnp.maximum(jnp.where(is_diag, cos_self[:, :, None], cos_off), 1e-6)

    # --- softmax branch ---
    s_s = cos * w_s + b_s                             # (bs, M, N)
    m_nk = jnp.max(s_s, axis=-1)                      # (bs, M)  (reused for prec1)
    lse = jnp.log(jnp.sum(jnp.exp(s_s - m_nk[:, :, None]), axis=-1)) + m_nk
    diag_s = cos_self * w_s + b_s                     # diag taken directly (no masked sum)
    loss_softmax_sum = jnp.sum(lse - diag_s)

    # --- contrast branch: sigmoid only on (bs, M) values (monotone => max commutes) ---
    s_c = cos * w_c + b_c
    off_max = jnp.max(jnp.where(is_diag, -jnp.inf, s_c), axis=-1)     # (bs, M)
    loss_contrast_sum = jnp.sum(
        1.0 - jax.nn.sigmoid(cos_self * w_c + b_c) + jax.nn.sigmoid(off_max))

    # --- prec1: top-1 accuracy, reusing m_nk as the row max ---
    first_argmax = jnp.min(jnp.where(s_s == m_nk[:, :, None], k_idx, N), axis=-1)
    correct = jnp.sum((first_argmax == spk).astype(jnp.float32))

    # --- lane-dense (8,128) partial-result tile ---
    lane = lax.broadcasted_iota(jnp.int32, (8, 128), 1)
    sub = lax.broadcasted_iota(jnp.int32, (8, 128), 0)
    row0 = jnp.where(lane == 0, loss_softmax_sum,
           jnp.where(lane == 1, loss_contrast_sum,
           jnp.where(lane == 2, correct, 0.0)))
    out_ref[...] = jnp.where(sub == 0, row0, 0.0)[None]


def ge2e_fusion(dvecs, params, *, num_blocks=None, interpret=False):
    """dvecs: (N, M, D) f32; params: (4,) f32 = (w_softmax, b_softmax, w_contrast, b_contrast).

    Returns (loss_softmax + loss_contrast, prec1), matching GE2ELoss_fusion.forward.
    """
    N, M, D = dvecs.shape
    assert M >= 2
    dvecs = dvecs.astype(jnp.float32)
    params = params.astype(jnp.float32)

    # Zero-pad the feature (lane) dim to a multiple of 128: cosine similarity is
    # invariant to zero padding, and this makes all D-axis work lane dense.
    Dp = max(128, ((D + 127) // 128) * 128)
    if Dp != D:
        dvecs = jnp.pad(dvecs, ((0, 0), (0, 0), (0, Dp - D)))

    # Grid over query-speaker blocks ("parallel" => v7x's two TensorCores split it;
    # a cheap 2-step sequential loop on v5e/v6e).
    if num_blocks is None:
        num_blocks = 2 if (N % 2 == 0 and N >= 2) else 1
    assert N % num_blocks == 0
    bs = N // num_blocks

    partial = pl.pallas_call(
        functools.partial(_ge2e_fusion_kernel, bs),
        out_shape=jax.ShapeDtypeStruct((num_blocks, 8, 128), jnp.float32),
        grid_spec=pltpu.PrefetchScalarGridSpec(
            num_scalar_prefetch=0,
            grid=(num_blocks,),
            in_specs=[
                pl.BlockSpec((N, M, Dp), lambda j: (0, 0, 0)),   # whole tensor, stays resident
                pl.BlockSpec(memory_space=pltpu.MemorySpace.SMEM),
            ],
            out_specs=pl.BlockSpec((1, 8, 128), lambda j: (j, 0, 0)),
        ),
        compiler_params=pltpu.CompilerParams(
            dimension_semantics=("parallel",),
            vmem_limit_bytes=32 * 1024 * 1024,
        ),
        interpret=interpret,
    )(dvecs, params)

    denom = float(N * M)
    loss_softmax = jnp.sum(partial[:, 0, 0]) / denom
    loss_contrast = jnp.sum(partial[:, 0, 1]) / denom
    prec1 = jnp.sum(partial[:, 0, 2]) * (100.0 / denom)
    return loss_softmax + loss_contrast, prec1


def ge2e_fusion_ref(x, w_s, b_s, w_c, b_c):
    """Pure-JAX reference for validation."""
    N, M, D = x.shape
    sums = jnp.sum(x, axis=1)
    centroids = sums / M
    excl = (sums[:, None, :] - x) / (M - 1)
    x_norm = jnp.linalg.norm(x, axis=-1)
    c_norm = jnp.linalg.norm(centroids, axis=-1)
    e_norm = jnp.linalg.norm(excl, axis=-1)
    dots = jnp.einsum("nmd,kd->nmk", x, centroids)
    cos = dots / (x_norm[:, :, None] * c_norm[None, None, :])
    cos_self = jnp.sum(x * excl, axis=-1) / (x_norm * e_norm)
    diag = jnp.arange(N)[:, None, None] == jnp.arange(N)[None, None, :]
    cos = jnp.where(diag, cos_self[:, :, None], cos)
    cos = jnp.maximum(cos, 1e-6)

    s_s = cos * w_s + b_s
    lse = jax.nn.logsumexp(s_s, axis=-1)
    diag_s = jnp.sum(jnp.where(diag, s_s, 0.0), axis=-1)
    loss_softmax = jnp.sum(lse - diag_s) / (N * M)

    s_c = cos * w_c + b_c
    sig = jax.nn.sigmoid(s_c)
    diag_sig = jnp.sum(jnp.where(diag, sig, 0.0), axis=-1)
    off_max = jnp.max(jnp.where(diag, -jnp.inf, sig), axis=-1)
    loss_contrast = jnp.sum(1.0 - diag_sig + off_max) / (N * M)

    pred = jnp.argmax(s_s, axis=-1)
    spk = jnp.arange(N)[:, None]
    prec1 = 100.0 * jnp.mean((pred == spk).astype(jnp.float32))
    return loss_softmax + loss_contrast, prec1


if __name__ == "__main__":
    key = jax.random.PRNGKey(0)
    N, M, D = 4, 8, 64            # num_speakers, num_utts_per_speaker (>=2), dvec_feats
    dvecs = jax.random.normal(key, (N, M, D), dtype=jnp.float32)
    # deterministic parameter init from module __init__: w=10.0, b=-5.0 for both branches
    params = jnp.array([10.0, -5.0, 10.0, -5.0], dtype=jnp.float32)

    loss, prec1 = ge2e_fusion(dvecs, params)
    jax.block_until_ready((loss, prec1))

    ref_loss, ref_prec = ge2e_fusion_ref(dvecs, 10.0, -5.0, 10.0, -5.0)
    assert abs(float(loss) - float(ref_loss)) <= 5e-3 * max(1.0, abs(float(ref_loss))), (
        float(loss), float(ref_loss))
    assert abs(float(prec1) - float(ref_prec)) <= 1e-2, (float(prec1), float(ref_prec))

    print("KERNEL_OK")
</pallas_src>

<mosaic_0001>
module attributes {stable_mosaic.version = 11 : i64} {
  func.func @_ge2e_fusion_kernel(%arg0: i32, %arg1: memref<4x8x128xf32, #tpu.memory_space<vmem>>, %arg2: memref<4xf32, #tpu.memory_space<smem>>, %arg3: memref<1x8x128xf32, #tpu.memory_space<vmem>>) attributes {dimension_semantics = [#tpu.dimension_semantics<parallel>], iteration_bounds = array<i64: 2>, scalar_prefetch = 0 : i64, scratch_operands = 0 : i64, tpu.core_type = #tpu.core_type<tc>, window_params = [{pipeline_mode = #tpu.pipeline_mode<synchronous>, transform_indices = @transform_0, window_bounds = array<i64: 4, 8, 128>}, {transform_indices = @transform_1, window_bounds = array<i64: 4>}, {transform_indices = @transform_2, window_bounds = array<i64: 1, 8, 128>}]} {
    %c0 = arith.constant 0 : index
    %0 = memref.load %arg2[%c0] : memref<4xf32, #tpu.memory_space<smem>>
    %c1 = arith.constant 1 : index
    %1 = memref.load %arg2[%c1] : memref<4xf32, #tpu.memory_space<smem>>
    %c2 = arith.constant 2 : index
    %2 = memref.load %arg2[%c2] : memref<4xf32, #tpu.memory_space<smem>>
    %c3 = arith.constant 3 : index
    %3 = memref.load %arg2[%c3] : memref<4xf32, #tpu.memory_space<smem>>
    %c2_i32 = arith.constant 2 : i32
    %4 = arith.muli %arg0, %c2_i32 : i32
    %5 = arith.index_cast %4 : i32 to index
    %c0_0 = arith.constant 0 : index
    %c0_1 = arith.constant 0 : index
    %6 = vector.load %arg1[%5, %c0_0, %c0_1] : memref<4x8x128xf32, #tpu.memory_space<vmem>>, vector<2x8x128xf32>
    %c0_2 = arith.constant 0 : index
    %c0_3 = arith.constant 0 : index
    %c0_4 = arith.constant 0 : index
    %7 = vector.load %arg1[%c0_2, %c0_3, %c0_4] : memref<4x8x128xf32, #tpu.memory_space<vmem>>, vector<4x8x128xf32>
    %cst = arith.constant dense<0.000000e+00> : vector<4x128xf32>
    %8 = vector.multi_reduction <add>, %7, %cst [1] : vector<4x8x128xf32> to vector<4x128xf32>
    %cst_5 = arith.constant 1.250000e-01 : f32
    %9 = vector.broadcast %cst_5 : f32 to vector<4x128xf32>
    %10 = arith.mulf %8, %9 : vector<4x128xf32>
    %11 = arith.mulf %10, %10 : vector<4x128xf32>
    %cst_6 = arith.constant dense<0.000000e+00> : vector<4xf32>
    %12 = vector.multi_reduction <add>, %11, %cst_6 [1] : vector<4x128xf32> to vector<4xf32>
    %13 = math.rsqrt %12 : vector<4xf32>
    %14 = arith.mulf %6, %6 : vector<2x8x128xf32>
    %cst_7 = arith.constant dense<0.000000e+00> : vector<2x8xf32>
    %15 = vector.multi_reduction <add>, %14, %cst_7 [2] : vector<2x8x128xf32> to vector<2x8xf32>
    %16 = math.rsqrt %15 : vector<2x8xf32>
    %cst_8 = arith.constant dense<0.000000e+00> : vector<2x128xf32>
    %17 = vector.multi_reduction <add>, %6, %cst_8 [1] : vector<2x8x128xf32> to vector<2x128xf32>
    %18 = arith.mulf %17, %17 : vector<2x128xf32>
    %cst_9 = arith.constant dense<0.000000e+00> : vector<2xf32>
    %19 = vector.multi_reduction <add>, %18, %cst_9 [1] : vector<2x128xf32> to vector<2xf32>
    %20 = vector.shape_cast %6 : vector<2x8x128xf32> to vector<16x128xf32>
    %cst_10 = arith.constant dense<0.000000e+00> : vector<16x4xf32>
    %21 = tpu.matmul %20, %10, %cst_10 {dimension_numbers = #tpu.dot_dimension_numbers<[1], [1], [0], [0], [0, 0, 1, 0], [], []>} : vector<16x128xf32>, vector<4x128xf32>, vector<16x4xf32> -> vector<16x4xf32>
    %22 = vector.shape_cast %21 : vector<16x4xf32> to vector<2x8x4xf32>
    %23 = tpu.iota {dimensions = array<i32: 2>} : vector<2x8x4xi32>
    %24 = tpu.iota {dimensions = array<i32: 0>} : vector<2x8xi32>
    %25 = vector.broadcast %4 : i32 to vector<2x8xi32>
    %26 = arith.addi %24, %25 : vector<2x8xi32>
    %27 = vector.shape_cast %26 : vector<2x8xi32> to vector<2x8x1xi32>
    %28 = vector.broadcast %27 : vector<2x8x1xi32> to vector<2x8x4xi32>
    %29 = arith.cmpi eq, %23, %28 : vector<2x8x4xi32>
    %cst_11 = arith.constant 0.000000e+00 : f32
    %30 = vector.broadcast %cst_11 : f32 to vector<2x8x4xf32>
    %31 = arith.select %29, %22, %30 : vector<2x8x4xi1>, vector<2x8x4xf32>
    %cst_12 = arith.constant dense<0.000000e+00> : vector<2x8xf32>
    %32 = vector.multi_reduction <add>, %31, %cst_12 [2] : vector<2x8x4xf32> to vector<2x8xf32>
    %cst_13 = arith.constant 8.000000e+00 : f32
    %33 = vector.broadcast %cst_13 : f32 to vector<2x8xf32>
    %34 = arith.mulf %33, %32 : vector<2x8xf32>
    %35 = vector.shape_cast %19 : vector<2xf32> to vector<2x1xf32>
    %cst_14 = arith.constant 2.000000e+00 : f32
    %36 = vector.broadcast %cst_14 : f32 to vector<2x8xf32>
    %37 = arith.mulf %36, %34 : vector<2x8xf32>
    %38 = vector.broadcast %35 : vector<2x1xf32> to vector<2x8xf32>
    %39 = arith.subf %38, %37 : vector<2x8xf32>
    %40 = arith.addf %39, %15 : vector<2x8xf32>
    %cst_15 = arith.constant 9.99999996E-13 : f32
    %41 = vector.broadcast %cst_15 : f32 to vector<2x8xf32>
    %42 = arith.maximumf %40, %41 : vector<2x8xf32>
    %43 = arith.subf %34, %15 : vector<2x8xf32>
    %44 = arith.mulf %43, %16 : vector<2x8xf32>
    %45 = math.rsqrt %42 : vector<2x8xf32>
    %46 = arith.mulf %44, %45 : vector<2x8xf32>
    %cst_16 = arith.constant 9.99999997E-7 : f32
    %47 = vector.broadcast %cst_16 : f32 to vector<2x8xf32>
    %48 = arith.maximumf %46, %47 : vector<2x8xf32>
    %49 = vector.shape_cast %16 : vector<2x8xf32> to vector<2x8x1xf32>
    %50 = vector.broadcast %49 : vector<2x8x1xf32> to vector<2x8x4xf32>
    %51 = arith.mulf %22, %50 : vector<2x8x4xf32>
    %52 = vector.shape_cast %13 : vector<4xf32> to vector<1x1x4xf32>
    %53 = vector.broadcast %52 : vector<1x1x4xf32> to vector<2x8x4xf32>
    %54 = arith.mulf %51, %53 : vector<2x8x4xf32>
    %55 = vector.shape_cast %48 : vector<2x8xf32> to vector<2x8x1xf32>
    %56 = vector.shape_cast %55 : vector<2x8x1xf32> to vector<2x8x1xf32>
    %57 = vector.broadcast %56 : vector<2x8x1xf32> to vector<2x8x4xf32>
    %58 = arith.select %29, %57, %54 : vector<2x8x4xi1>, vector<2x8x4xf32>
    %cst_17 = arith.constant 9.99999997E-7 : f32
    %59 = vector.broadcast %cst_17 : f32 to vector<2x8x4xf32>
    %60 = arith.maximumf %58, %59 : vector<2x8x4xf32>
    %61 = vector.broadcast %0 : f32 to vector<2x8x4xf32>
    %62 = arith.mulf %60, %61 : vector<2x8x4xf32>
    %63 = vector.broadcast %1 : f32 to vector<2x8x4xf32>
    %64 = arith.addf %62, %63 : vector<2x8x4xf32>
    %cst_18 = arith.constant dense<0xFF800000> : vector<2x8xf32>
    %65 = vector.multi_reduction <maximumf>, %64, %cst_18 [2] : vector<2x8x4xf32> to vector<2x8xf32>
    %66 = vector.shape_cast %65 : vector<2x8xf32> to vector<2x8x1xf32>
    %67 = vector.broadcast %66 : vector<2x8x1xf32> to vector<2x8x4xf32>
    %68 = arith.subf %64, %67 : vector<2x8x4xf32>
    %69 = math.exp %68 : vector<2x8x4xf32>
    %cst_19 = arith.constant dense<0.000000e+00> : vector<2x8xf32>
    %70 = vector.multi_reduction <add>, %69, %cst_19 [2] : vector<2x8x4xf32> to vector<2x8xf32>
    %71 = math.log %70 : vector<2x8xf32>
    %72 = arith.addf %71, %65 : vector<2x8xf32>
    %73 = vector.broadcast %0 : f32 to vector<2x8xf32>
    %74 = arith.mulf %48, %73 : vector<2x8xf32>
    %75 = vector.broadcast %1 : f32 to vector<2x8xf32>
    %76 = arith.addf %74, %75 : vector<2x8xf32>
    %77 = arith.subf %72, %76 : vector<2x8xf32>
    %78 = vector.shape_cast %77 : vector<2x8xf32> to vector<1x2x8xf32>
    %cst_20 = arith.constant dense<0.000000e+00> : vector<1xf32>
    %79 = vector.multi_reduction <add>, %78, %cst_20 [1, 2] : vector<1x2x8xf32> to vector<1xf32>
    %80 = vector.shape_cast %79 : vector<1xf32> to vector<1x1x1xf32>
    %81 = vector.extract %80[0, 0, 0] : f32 from vector<1x1x1xf32>
    %82 = vector.broadcast %2 : f32 to vector<2x8x4xf32>
    %83 = arith.mulf %60, %82 : vector<2x8x4xf32>
    %84 = vector.broadcast %3 : f32 to vector<2x8x4xf32>
    %85 = arith.addf %83, %84 : vector<2x8x4xf32>
    %cst_21 = arith.constant 0xFF800000 : f32
    %86 = vector.broadcast %cst_21 : f32 to vector<2x8x4xf32>
    %87 = arith.select %29, %86, %85 : vector<2x8x4xi1>, vector<2x8x4xf32>
    %cst_22 = arith.constant dense<0xFF800000> : vector<2x8xf32>
    %88 = vector.multi_reduction <maximumf>, %87, %cst_22 [2] : vector<2x8x4xf32> to vector<2x8xf32>
    %89 = vector.broadcast %2 : f32 to vector<2x8xf32>
    %90 = arith.mulf %48, %89 : vector<2x8xf32>
    %91 = vector.broadcast %3 : f32 to vector<2x8xf32>
    %92 = arith.addf %90, %91 : vector<2x8xf32>
    %93 = arith.negf %92 : vector<2x8xf32>
    %94 = math.exp %93 : vector<2x8xf32>
    %cst_23 = arith.constant 1.000000e+00 : f32
    %95 = vector.broadcast %cst_23 : f32 to vector<2x8xf32>
    %96 = arith.addf %95, %94 : vector<2x8xf32>
    %97 = arith.divf %95, %96 : vector<2x8xf32>
    %cst_24 = arith.constant 1.000000e+00 : f32
    %98 = vector.broadcast %cst_24 : f32 to vector<2x8xf32>
    %99 = arith.subf %98, %97 : vector<2x8xf32>
    %100 = arith.negf %88 : vector<2x8xf32>
    %101 = math.exp %100 : vector<2x8xf32>
    %cst_25 = arith.constant 1.000000e+00 : f32
    %102 = vector.broadcast %cst_25 : f32 to vector<2x8xf32>
    %103 = arith.addf %102, %101 : vector<2x8xf32>
    %104 = arith.divf %102, %103 : vector<2x8xf32>
    %105 = arith.addf %99, %104 : vector<2x8xf32>
    %106 = vector.shape_cast %105 : vector<2x8xf32> to vector<1x2x8xf32>
    %cst_26 = arith.constant dense<0.000000e+00> : vector<1xf32>
    %107 = vector.multi_reduction <add>, %106, %cst_26 [1, 2] : vector<1x2x8xf32> to vector<1xf32>
    %108 = vector.shape_cast %107 : vector<1xf32> to vector<1x1x1xf32>
    %109 = vector.extract %108[0, 0, 0] : f32 from vector<1x1x1xf32>
    %110 = vector.shape_cast %65 : vector<2x8xf32> to vector<2x8x1xf32>
    %111 = vector.broadcast %110 : vector<2x8x1xf32> to vector<2x8x4xf32>
    %112 = arith.cmpf oeq, %64, %111 : vector<2x8x4xf32>
    %c4_i32 = arith.constant 4 : i32
    %113 = vector.broadcast %c4_i32 : i32 to vector<2x8x4xi32>
    %114 = arith.select %112, %23, %113 : vector<2x8x4xi1>, vector<2x8x4xi32>
    %cst_27 = arith.constant dense<2147483647> : vector<2x8xi32>
    %115 = vector.multi_reduction <minsi>, %114, %cst_27 [2] : vector<2x8x4xi32> to vector<2x8xi32>
    %116 = arith.cmpi eq, %115, %26 : vector<2x8xi32>
    %117 = arith.extui %116 : vector<2x8xi1> to vector<2x8xi32>
    %118 = arith.sitofp %117 : vector<2x8xi32> to vector<2x8xf32>
    %119 = vector.shape_cast %118 : vector<2x8xf32> to vector<1x2x8xf32>
    %cst_28 = arith.constant dense<0.000000e+00> : vector<1xf32>
    %120 = vector.multi_reduction <add>, %119, %cst_28 [1, 2] : vector<1x2x8xf32> to vector<1xf32>
    %121 = vector.shape_cast %120 : vector<1xf32> to vector<1x1x1xf32>
    %122 = vector.extract %121[0, 0, 0] : f32 from vector<1x1x1xf32>
    %123 = tpu.iota {dimensions = array<i32: 1>} : vector<8x128xi32>
    %124 = tpu.iota {dimensions = array<i32: 0>} : vector<8x128xi32>
    %c0_i32 = arith.constant 0 : i32
    %125 = vector.broadcast %c0_i32 : i32 to vector<8x128xi32>
    %126 = arith.cmpi eq, %123, %125 : vector<8x128xi32>
    %c1_i32 = arith.constant 1 : i32
    %127 = vector.broadcast %c1_i32 : i32 to vector<8x128xi32>
    %128 = arith.cmpi eq, %123, %127 : vector<8x128xi32>
    %c2_i32_29 = arith.constant 2 : i32
    %129 = vector.broadcast %c2_i32_29 : i32 to vector<8x128xi32>
    %130 = arith.cmpi eq, %123, %129 : vector<8x128xi32>
    %cst_30 = arith.constant 0.000000e+00 : f32
    %131 = vector.broadcast %122 : f32 to vector<8x128xf32>
    %132 = vector.broadcast %cst_30 : f32 to vector<8x128xf32>
    %133 = arith.select %130, %131, %132 : vector<8x128xi1>, vector<8x128xf32>
    %134 = vector.broadcast %109 : f32 to vector<8x128xf32>
    %135 = arith.select %128, %134, %133 : vector<8x128xi1>, vector<8x128xf32>
    %136 = vector.broadcast %81 : f32 to vector<8x128xf32>
    %137 = arith.select %126, %136, %135 : vector<8x128xi1>, vector<8x128xf32>
    %c0_i32_31 = arith.constant 0 : i32
    %138 = vector.broadcast %c0_i32_31 : i32 to vector<8x128xi32>
    %139 = arith.cmpi eq, %124, %138 : vector<8x128xi32>
    %cst_32 = arith.constant 0.000000e+00 : f32
    %140 = vector.broadcast %cst_32 : f32 to vector<8x128xf32>
    %141 = arith.select %139, %137, %140 : vector<8x128xi1>, vector<8x128xf32>
    %142 = vector.shape_cast %141 : vector<8x128xf32> to vector<1x8x128xf32>
    %c0_33 = arith.constant 0 : index
    %c0_34 = arith.constant 0 : index
    %c0_35 = arith.constant 0 : index
    %143 = vector.load %arg3[%c0_33, %c0_34, %c0_35] : memref<1x8x128xf32, #tpu.memory_space<vmem>>, vector<1x8x128xf32>
    tpu.vector_store %arg3[%c0_33, %c0_34, %c0_35], %142 {strides = array<i32>} : memref<1x8x128xf32, #tpu.memory_space<vmem>>, vector<1x8x128xf32>,
    return
  }
  func.func @transform_0(%arg0: i32) -> (i32, i32, i32) {
    %c0_i32 = arith.constant 0 : i32
    %c0_i32_0 = arith.constant 0 : i32
    %c0_i32_1 = arith.constant 0 : i32
    %c0_i32_2 = arith.constant 0 : i32
    return %c0_i32, %c0_i32_0, %c0_i32_1 : i32, i32, i32
  }
  func.func @transform_1(%arg0: i32) -> i32 {
    %c0_i32 = arith.constant 0 : i32
    %c0_i32_0 = arith.constant 0 : i32
    return %c0_i32 : i32
  }
  func.func @transform_2(%arg0: i32) -> (i32, i32, i32) {
    %c0_i32 = arith.constant 0 : i32
    %c0_i32_0 = arith.constant 0 : i32
    %c0_i32_1 = arith.constant 0 : i32
    return %arg0, %c0_i32, %c0_i32_0 : i32, i32, i32
  }
}

</mosaic_0001>

<bundles_post_ra>
// kernel: tpu_custom_call.1
= control target key start
LH: loop header
LB: loop body
LE: loop exit
PB: predicated region body
PF: predicated region fallthrough
CT: control target
= control target key end

     0   :  { %7 = vsyncpa [#allocation3], 0  ;;  %s1323_s0 = inlined_call_operand.hbm [shape: f32[4,8,128], index: 0, kind: input, shape index: {}]   ;;  %s1324_s1 = inlined_call_operand.vmem [shape: f32[4], index: 1, kind: input, shape index: {}]   ;;  %s1325_s2 = inlined_call_operand.hbm [shape: f32[2,8,128], index: 2, kind: output, shape index: {}]  }
   0x1   :  { %8 = vsyncpa [#allocation5], 0 }
   0x2   :  { %9 = vsyncpa [#allocation4], 0 }
   0x3   :  { %11 = vsyncpa [#allocation4 + $0x1], 0  ;;  %s1025_s9 = smov 0   ;;  %s1027_s10 = smov 0  }
   0x4   :  { %s1029_s11 = smov 0   ;;  %s1031_s12 = smov 0  }
   0x5 LB: > { %s1046_s13 = sadd.s32 4294967295, %s1001_s12   ;;  %s747_s14 = sadd.s32 4294967294, %s1001_s12   ;;  %s1001_s12 = sphi %s1031_s12, %s1343_s12   ;;  %s997_s11 = sphi %s1029_s11, %s1342_s11   ;;  %s993_s10 = sphi %s1027_s10, %s1341_s10   ;;  %s989_s9 = sphi %s1025_s9, %s1340_s9  }
   0x6   : > { %s1050_s15 = sadd.s32 1, %s1001_s12   ;;  %s66_s16 = sadd.s32 1, %s997_s11 }
   0x7   : > { %s63_s17 = ssub.s32 %s1001_s12, %s1050_s15  ;;  %p76_p0 = scmp.ne.s32.totalorder %s997_s11, %s993_s10 }
   0x8   : > { %p64_p1 = scmp.eq.s32.totalorder %s63_s17, 0  ;;  %p77_p2 = scmp.eq.s32.totalorder %s1046_s13, 1 }
   0x9   : > { %p82_p3 = scmp.ne.s32.totalorder %s993_s10, %s989_s9  ;;  %p83_p4 = scmp.eq.s32.totalorder %s747_s14, 1 }
   0xa   : > { %s1061_s18 = scalar_select %p64_p1, %s997_s11, %s66_s16  }
   0xb   : > { %p1063_p5 = por %p77_p2, %p76_p0  ;;  %p1067_p6 = por %p83_p4, %p82_p3 }
   0xc   : > { %p748_p7 = scmp.ge.s32.totalorder %s1001_s12, 1  ;;  %p90_p8 = scmp.lt.s32.totalorder %s1001_s12, 3 }
   0xd   : > { %s1329_s19 = scalar_select %p1063_p5, 1, 0 }
   0xe   : > { %s1330_s20 = scalar_select %p1067_p6, 1, 0 }
   0xf   : > { %p1326_p9 = scmp.eq.s32.totalorder %s1046_s13, 0  ;;  %p1074_p10 = pnand %p748_p7, %p90_p8 }
  0x10   : > { %s1003_s22 = smov [#allocation2]   ;;  %s116_s26 = sshll.u32 %s1324_s1, 4  ;;  %s1089_s26 = int_to_ptr.vmem [resolvable:$true] %s116_s26 }
  0x11   : > { %s1331_s21 = scalar_select %p1074_p10, 1, 0 }
  0x12   : > { %s102_s23 = sshll.u32 %s1003_s22, 4  ;;  %p795_p11 = pneg %p1074_p10  ;;  %s103_s23 = int_to_ptr.vmem [resolvable:$true] %s102_s23 }
  0x13   : > { %s888_s30 = scalar_lea.hbm %s1323_s0, 512 }
  0x14   : > { %p1085_p12 = pnand %p1326_p9, %p795_p11  ;;  %p889_p13 = scmp.ne.s32.totalorder %s1323_s0, %s888_s30 }
  0x15   : > { %p895_p3 = scmp.lt.u32.totalorder %s888_s30, %s1323_s0 }
  0x16   : > { %p890_p0 = pneg %p1085_p12 }
  0x18   : > { %p891_p1 = pnand %p890_p0, %p889_p13 }
  0x1a   : > { %p892_p2 = pneg %p891_p1 }
  0x1c   : > { %p897_p4 = pnand %p895_p3, %p892_p2 }
  0x1e   : > { %900 = shalt.err (!%p897_p4)
}
  0x1f   : > { %s901_s7 = scalar_lea.vmem %s103_s23, 512  ;;  %p909_p9 = scmp.lt.s32.totalorder %s103_s23, %s103_s23 }
  0x20   : > { %p902_p7 = scmp.ne.s32.totalorder %s103_s23, %s901_s7  ;;  %p910_p6 = scmp.lt.s32.totalorder %s901_s7, %s901_s7 }
  0x22   : > { %p904_p8 = pnand %p902_p7, %p890_p0  ;;  %p911_p5 = por %p910_p6, %p909_p9 }
  0x24   : > { %p905_p11 = pneg %p904_p8 }
  0x26   : > { %p912_p10 = pnand %p911_p5, %p905_p11 }
  0x28   : > { %915 = shalt.err (!%p912_p10)
}
  0x29   : > { %s1004_s8 = smov 128   ;;  %s1005_s14 = smov 8  }
  0x2a   : > { %798 = dma.hbm_to_vmem [thread:$0]  (!%p1085_p12), %s1323_s0, 512, %s103_s23, [#allocation3], %s1004_s8, %s1004_s8, %s1005_s14  }
  0x2b   : > { %s916_s22 = scalar_lea.vmem %s1089_s26, 16  ;;  %p924_p5 = scmp.lt.s32.totalorder %s1089_s26, %s1089_s26 }
  0x2c   : > { %p917_p13 = scmp.ne.s32.totalorder %s1089_s26, %s916_s22  ;;  %p925_p9 = scmp.lt.s32.totalorder %s916_s22, %s916_s22 }
  0x2e   : > { %p919_p1 = pnand %p917_p13, %p890_p0  ;;  %p926_p10 = por %p925_p9, %p924_p5 }
  0x30   : > { %p920_p6 = pneg %p919_p1 }
  0x32   : > { %p927_p2 = pnand %p926_p10, %p920_p6 }
  0x34   : > { %930 = shalt.err (!%p927_p2)
}
  0x35   : > { %s1006_s24 = smov [#allocation6]   ;;  %p1333_p3 = scmp.ne.s32.totalorder %s1331_s21, 0 }
  0x36   : > { %801 = dma.vmem_to_smem (!%p1085_p12), %s1089_s26, 16, %s1006_s24, [#allocation5]  }
  0x37   : > { %129 = sbr.rel (%p1333_p3) target bundleno = 1537 (0x601), region = 28  ;;  %p1334_p4 = scmp.eq.s32.totalorder (!%p1333_p3), %s1046_s13, 0 }
  0x3e   : > { %976 = dma.done.wait (%p1334_p4), [#allocation3], 512   ;;  %p1335_p0 = pmov %p1334_p4 }
  0x40   : > { %978 = vsyncadd (%p1335_p0), [#allocation3], 4294966784  ;;  %p1336_p7 = pmov %p1335_p0 }
  0x41   : > { %p1337_p8 = pmov %p1335_p0 }
  0x42   : > { %980 = dma.done.wait (%p1336_p7), [#allocation5], 16  }
  0x43   : > { %982 = vsyncadd (%p1337_p8), [#allocation5], 4294967280 }
  0x44   : > { %139 = sfence }
  0x45   : > { %v160_v0 = vld [vmem:[#allocation2] sm:$0xff]  ;;  %v161_v1 = vld [vmem:[#allocation2 + $0x8] sm:$0xff]  ;;  %v162_v2 = vld [vmem:[#allocation2 + $0x10] sm:$0xff]  ;;  %s770_s21 = sshll.u32 %s1046_s13, 4  ;;  %vm200_vm0 = vcmask 1041409   ;;  %vm202_vm1 = vcmask 1042434   ;;  %v325_v54 = vlaneseq }
  0x46   : > { %v163_v3 = vld [vmem:[#allocation2 + $0x18] sm:$0xff]  ;;  %v164_v4 = vrot.slane %v160_v0, 4  ;;  %v170_v5 = vrot.slane %v161_v1, 4  ;;  %v176_v6 = vrot.slane %v162_v2, 4  ;;  %s157_s23 = scalar_lea.vmem [#allocation2], %s770_s21  ;;  %vm204_vm2 = vcmask 1043459  }
  0x47   : > { %v182_v7 = vrot.slane %v163_v3, 4  ;;  %v158_v11 = vld [vmem:[%s157_s23] sm:$0xff]  ;;  %v159_v17 = vld [vmem:[%s157_s23 + $0x8] sm:$0xff]  ;;  %s758_s25 = sshll.u32 %s1046_s13, 1  ;;  %v1151_v55 = vshrl.u32 %v325_v54, 7  ;;  %v1156_v60 = vand.u32 127, %v325_v54 }
  0x48   : > { %v165_v8 = vadd.f32 %v164_v4, %v160_v0  ;;  %v171_v9 = vadd.f32 %v170_v5, %v161_v1  ;;  %v177_v10 = vadd.f32 %v176_v6, %v162_v2  ;;  %776 = vmatprep.mubr.f32.mxu0 %v158_v11  ;;  %v212_v13 = vmul.f32 %v158_v11, %v158_v11  ;;  %s151_s26 = sld [smem:[#allocation6]]  ;;  %s755_s27 = sld [smem:[#allocation6 + $0x1]] }
  0x49   : > { %v183_v12 = vadd.f32 %v182_v7, %v163_v3  ;;  %v213_v19 = vmul.f32 %v159_v17, %v159_v17  ;;  %v220_v39 = vrot.slane %v158_v11, 4  ;;  %v226_v40 = vrot.slane %v159_v17, 4  ;;  %s756_s28 = sld [smem:[#allocation6 + $0x2]]  ;;  %s757_s29 = sld [smem:[#allocation6 + $0x3]] }
  0x4a   : > { %v166_v14 = vrot.slane %v165_v8, 2  ;;  %v172_v15 = vrot.slane %v171_v9, 2  ;;  %v178_v16 = vrot.slane %v177_v10, 2  ;;  %214 = vadd.xlane.f32.xlu1 %v212_v13  ;;  %v329_v56 = vstv %s758_s25  ;;  %s148_s30 = sand.u32 1, %s993_s10   ;;  %s767_s7 = sshll.u32 %s1046_s13, 7 }
  0x4b   : > { %v184_v18 = vrot.slane %v183_v12, 2  ;;  %v221_v41 = vadd.f32 %v220_v39, %v158_v11  ;;  %v227_v42 = vadd.f32 %v226_v40, %v159_v17  ;;  %v330_v57 = vadd.s32 %v329_v56, %v1151_v55  ;;  %s754_s3 = sshll.u32 %s148_s30, 3  ;;  %s1281_s22 = scalar_lea.hbm %s1325_s2, %s767_s7 }
  0x4c   : > { %v167_v20 = vadd.f32 %v166_v14, %v165_v8  ;;  %v173_v21 = vadd.f32 %v172_v15, %v171_v9  ;;  %v179_v22 = vadd.f32 %v178_v16, %v177_v10  ;;  %v333_v58 = vsub.s32 0, %v1151_v55  ;;  %s150_s8 = scalar_lea.vmem [#allocation7], %s754_s3  ;;  %s661_s13 = scalar_lea.sflag [#allocation4], %s148_s30 }
  0x4d   : > { %v185_v23 = vadd.f32 %v184_v18, %v183_v12  ;;  %v222_v43 = vrot.slane %v221_v41, 2  ;;  %v228_v44 = vrot.slane %v227_v42, 2  ;;  %v337_v59 = vsub.s32 1, %v1151_v55  ;;  %s674_s14 = sshll.u32 %s150_s8, 4  ;;  %p1338_p11 = scmp.ne.s32.totalorder %s1329_s19, 0  ;;  %s1283_s14 = int_to_ptr.vmem [resolvable:$true] %s674_s14 }
  0x4e   : > { %v168_v24 = vrot.slane %v167_v20, 1  ;;  %v174_v25 = vrot.slane %v173_v21, 1  ;;  %v180_v26 = vrot.slane %v179_v22, 1  ;;  %216 = vadd.xlane.f32.xlu1 %v213_v19  ;;  %v1158_v61 = vrot.slane %v330_v57, %v333_v58  ;;  %s931_s24 = scalar_lea.vmem %s1283_s14, 128  ;;  %s1009_s21 = smov [#allocation7]  }
  0x4f   : > { %v186_v27 = vrot.slane %v185_v23, 1  ;;  %v223_v45 = vadd.f32 %v222_v43, %v221_v41  ;;  %v229_v46 = vadd.f32 %v228_v44, %v227_v42  ;;  %v1160_v62 = vrot.slane %v330_v57, %v337_v59  ;;  %p932_p12 = scmp.ne.s32.totalorder %s1283_s14, %s931_s24  ;;  %s935_s23 = sshll.u32 %s1009_s21, 4  ;;  %s936_s23 = int_to_ptr.vmem [resolvable:$false] %s935_s23 }
  0x50   : > { %v169_v28 = vadd.f32 %v168_v24, %v167_v20  ;;  %v175_v29 = vadd.f32 %v174_v25, %v173_v21  ;;  %v181_v30 = vadd.f32 %v180_v26, %v179_v22  ;;  %vm339_vm3 = vcmp.eq.s32.totalorder %v1156_v60, %v1158_v61  ;;  %s937_s25 = scalar_lea.vmem %s936_s23, 256  ;;  %p938_p6 = scmp.lt.s32.totalorder %s1283_s14, %s936_s23 }
  0x51   : > { %v187_v31 = vadd.f32 %v186_v27, %v185_v23  ;;  %v224_v47 = vrot.slane %v223_v45, 1  ;;  %v230_v48 = vrot.slane %v229_v46, 1  ;;  %vm343_vm4 = vcmask 31744   ;;  %p933_p13 = pnand %p932_p12, %p1338_p11  ;;  %p939_p5 = scmp.lt.s32.totalorder %s937_s25, %s931_s24 }
  0x52   : > { %v1134_v32 = vmul.f32 0.125, %v169_v28  ;;  %v1136_v33 = vmul.f32 0.125, %v175_v29  ;;  %v1138_v34 = vmul.f32 0.125, %v181_v30  ;;  %vm340_vm5 = vcmp.eq.s32.totalorder %v1156_v60, %v1160_v62 }
  0x53   : > { %v1140_v35 = vmul.f32 0.125, %v187_v31  ;;  %v225_v49 = vadd.f32 %v224_v47, %v223_v45  ;;  %v231_v50 = vadd.f32 %v230_v48, %v229_v46  ;;  %vm238_vm6 = vcmask 1041408   ;;  %p934_p1 = pneg %p933_p13  ;;  %p940_p9 = por %p939_p5, %p938_p6 }
  0x54   : > { %v246_v36 = vsel %vm200_vm0, %v1136_v33, %v1134_v32  ;;  %v1182_v10 = vsub.s32 %v1156_v60, %v1151_v55  ;;  %v1007_v25 = vmov 0   ;;  %v192_v29 = vmul.f32 %v1134_v32, %v1134_v32 }
  0x55   : > { %v247_v37 = vsel %vm202_vm1, %v1138_v34, %v246_v36  ;;  %v232_v51 = vmul.f32 %v225_v49, %v225_v49  ;;  %v233_v52 = vmul.f32 %v231_v50, %v231_v50  ;;  %849 = vset.pattern.permute.xlu0 %v1007_v25  ;;  %850 = vset.pattern.permute.xlu1 %v1007_v25  ;;  %vm207_vm7 = vcmask 1043456   ;;  %p941_p10 = pnand %p940_p9, %p934_p1 }
  0x56   : > { %v248_v38 = vsel %vm204_vm2, %v1140_v35, %v247_v37  ;;  %v193_v30 = vmul.f32 %v1136_v33, %v1136_v33  ;;  %v194_v31 = vmul.f32 %v1138_v34, %v1138_v34  ;;  %v195_v37 = vmul.f32 %v1140_v35, %v1140_v35 }
  0x57   : > { %774 = vmatprep.subr.mxu0 %v248_v38  ;;  %v236_v53 = vsel %vm200_vm0, %v233_v52, %v232_v51  ;;  %vm495_vm14 = vcmask 58368   ;;  %vm650_vm15 = vcmp.eq.s32.totalorder %v1156_v60, 2 }
  0x58   : > { %775 = vmatpush3.xpose.msra.mxu0 %v248_v38  ;;  %v239_v5 = vsel %vm238_vm6, %v236_v53, 0.0  ;;  %v201_v36 = vsel %vm200_vm0, %v193_v30, %v192_v29 }
  0x59   : > { %v203_v38 = vsel %vm202_vm1, %v194_v31, %v201_v36  ;;  %vm648_vm1 = vcmp.eq.s32.totalorder %v1156_v60, 0 }
  0x5a   : > { %v205_v39 = vsel %vm204_vm2, %v195_v37, %v203_v38  ;;  %vm657_vm2 = vcmp.eq.s32.totalorder %v1151_v55, 0 }
  0x5b   : > { %777 = vmatmul.mubr.f32.vlgmr.msra.gmra.mrb[0].mxu0 %v159_v17  ;;  %v208_v40 = vsel %vm207_vm7, %v205_v39, 0.0 }
  0xd7   : > { %v215_v8 = vpop.xlane.xlu1 %214 }
  0xd8   : > { %v372_v15 = vrot.slane %v215_v8, %v1182_v10 }
  0xdb   : > { %v217_v14 = vpop.xlane.xlu1 %216 }
  0xdc   : > { %v376_v16 = vrot.slane %v217_v14, %v1182_v10 }
  0xde   : > { %v377_v22 = vsel %vm200_vm0, %v376_v16, %v372_v15 }
 0x12e   : > { %v1164_v63 = vpop.f32.mrb[0].mxu0 }
 0x12f   : > { %v1166_v0 = vpop.f32.mrb[1].mxu0  ;;  %v342_v3 = vsel %vm340_vm5, %v1164_v63, 0.0 }
 0x130   : > { %v341_v1 = vsel %vm339_vm3, %v1166_v0, 0.0  ;;  %v347_v4 = vsel %vm343_vm4, %v342_v3, 0.0 }
 0x131   : > { %v344_v2 = vsel %vm343_vm4, %v341_v1, 0.0 }
 0x132   : > { %345 = vadd.xlane.f32.xlu0 %v344_v2 }
 0x136   : > { %348 = vadd.xlane.f32.xlu0 %v347_v4  ;;  %v1219_v4 = vstv %s755_s27 }
 0x13a   : > { %240 = vadd.xlane.f32.xlu0 %v239_v5 }
 0x1bf   : > { %v346_v6 = vpop.xlane.xlu0 %345 }
 0x1c0   : > { %v350_v7 = vmul.f32 8.0, %v346_v6  ;;  %v506_v6 = vstv %s756_s28 }
 0x1c2   : > { %v352_v11 = vmul.f32 2.0, %v350_v7  ;;  %v381_v32 = vsub.f32 %v350_v7, %v215_v8 }
 0x1c3   : > { %v349_v9 = vpop.xlane.xlu0 %348 }
 0x1c4   : > { %v351_v12 = vmul.f32 8.0, %v349_v9  ;;  %v359_v17 = vrot.slane %v352_v11, %v1182_v10  ;;  %v509_v11 = vstv %s757_s29 }
 0x1c6   : > { %v353_v13 = vmul.f32 2.0, %v351_v12  ;;  %v382_v41 = vsub.f32 %v351_v12, %v217_v14 }
 0x1c7   : > { %v241_v19 = vpop.xlane.xlu0 %240 }
 0x1c8   : > { %v363_v18 = vrot.slane %v353_v13, %v1182_v10 }
 0x1ca   : > { %v364_v20 = vsel %vm200_vm0, %v363_v18, %v359_v17 }
 0x1cb   : > { %v366_v21 = vsub.f32 %v241_v19, %v364_v20 }
 0x1cd   : > { %v379_v23 = vadd.f32 %v377_v22, %v366_v21 }
 0x1cf   : > { %v380_v24 = vmax.f32 %v379_v23, 1e-12 }
 0x1d1   : > { %856 = vrsqrt.f32 %v380_v24 }
 0x1d2   : > { %858 = vrsqrt.f32 %v215_v8 }
 0x1d3   : > { %860 = vrsqrt.f32 %v217_v14 }
 0x1db   : > { %v857_v26 = vpop.eup %856 }
 0x1dc   : > { %v397_v27 = vrot.slane %v857_v26, %v337_v59  ;;  %v390_v28 = vrot.slane %v857_v26, %v333_v58  ;;  %v859_v33 = vpop.eup %858  ;;  %v1213_v59 = vstv %s151_s26 }
 0x1dd   : > { %v383_v42 = vmul.f32 %v859_v33, %v381_v32  ;;  %v861_v43 = vpop.eup %860  ;;  %v407_v52 = vmul.f32 %v859_v33, %v1166_v0 }
 0x1de   : > { %399 = vbcast.lane.b32.xlu0 %v397_v27, 256  ;;  %392 = vbcast.lane.b32.xlu1 %v390_v28, 256  ;;  %v384_v45 = vmul.f32 %v861_v43, %v382_v41  ;;  %v408_v56 = vmul.f32 %v861_v43, %v1164_v63 }
 0x202   : > { %209 = vadd.xlane.f32.xlu1 %v208_v40 }
 0x250   : > { %v400_v34 = vpop.permute.xlu0 %399  ;;  %v393_v44 = vpop.permute.xlu1 %392 }
 0x251   : > { %v403_v46 = vmul.f32 %v393_v44, %v383_v42  ;;  %v404_v47 = vmul.f32 %v400_v34, %v384_v45 }
 0x253   : > { %v1201_v35 = vmax.f32 %v403_v46, 1e-06  ;;  %v1204_v48 = vmax.f32 %v404_v47, 1e-06 }
 0x255   : > { %429 = vperm.xlu0 %849, %v1201_v35   ;;  %v520_v33 = vmul.f32 %v506_v6, %v1201_v35  ;;  %v521_v42 = vmul.f32 %v506_v6, %v1204_v48 }
 0x257   : > { %v522_v43 = vadd.f32 %v520_v33, %v509_v11  ;;  %v523_v44 = vadd.f32 %v521_v42, %v509_v11 }
 0x259   : > { %434 = vperm.xlu0 %849, %v1204_v48   ;;  %v760_v45 = vmul.f32 -1.442695, %v522_v43 }
 0x28f   : > { %v210_v49 = vpop.xlane.xlu1 %209 }
 0x290   : > { %862 = vrsqrt.f32 %v210_v49 }
 0x29a   : > { %v863_v50 = vpop.eup %862 }
 0x29b   : > { %v413_v51 = vrot.slane %v863_v50, %v1182_v10  ;;  %v761_v50 = vmul.f32 -1.442695, %v523_v44 }
 0x29d   : > { %v425_v53 = vmul.f32 %v413_v51, %v407_v52  ;;  %v426_v1 = vmul.f32 %v413_v51, %v408_v56 }
 0x2d4   : > { %v430_v54 = vpop.permute.xlu0 %429 }
 0x2d5   : > { %v437_v57 = vsel %vm339_vm3, %v430_v54, %v425_v53 }
 0x2d6   : > { %v439_v58 = vmax.f32 %v437_v57, 1e-06 }
 0x2d8   : > { %v442_v2 = vmul.f32 %v1213_v59, %v439_v58  ;;  %v435_v3 = vpop.permute.xlu0 %434  ;;  %v507_v22 = vmul.f32 %v506_v6, %v439_v58 }
 0x2d9   : > { %v438_v0 = vsel %vm340_vm5, %v435_v3, %v426_v1 }
 0x2da   : > { %v440_v5 = vmax.f32 %v438_v0, 1e-06  ;;  %v445_v63 = vadd.f32 %v1219_v4, %v442_v2  ;;  %v510_v31 = vadd.f32 %v509_v11, %v507_v22 }
 0x2dc   : > { %v443_v7 = vmul.f32 %v1213_v59, %v440_v5  ;;  %v508_v8 = vmul.f32 %v506_v6, %v440_v5  ;;  %v447_v9 = vsel %vm343_vm4, %v445_v63, -inf  ;;  %v512_v37 = vsel %vm339_vm3, -inf, %v510_v31 }
 0x2dd   : > { %448 = vmax.xlane.f32.xlu0 %v447_v9  ;;  %v514_v38 = vsel %vm343_vm4, %v512_v37, -inf  ;;  %v471_v9 = vmul.f32 %v1213_v59, %v1201_v35 }
 0x2de   : > { %v446_v12 = vadd.f32 %v1219_v4, %v443_v7  ;;  %v511_v13 = vadd.f32 %v509_v11, %v508_v8 }
 0x2e0   : > { %v450_v14 = vsel %vm343_vm4, %v446_v12, -inf  ;;  %v513_v15 = vsel %vm340_vm5, -inf, %v511_v13 }
 0x2e1   : > { %451 = vmax.xlane.f32.xlu1 %v450_v14  ;;  %v517_v16 = vsel %vm343_vm4, %v513_v15, -inf  ;;  %v472_v14 = vmul.f32 %v1213_v59, %v1204_v48 }
 0x2e2   : > { %518 = vmax.xlane.f32.xlu0 %v517_v16 }
 0x2e3   : > { %v474_v35 = vadd.f32 %v472_v14, %v1219_v4 }
 0x36a   : > { %v1230_v17 = vpop.xlane.xlu0 %448 }
 0x36b   : > { %v453_v18 = vsub.f32 %v445_v63, %v1230_v17  ;;  %vm580_vm8 = vcmp.eq.f32.partialorder %v445_v63, %v1230_v17 }
 0x36c   : > { %v582_v19 = vsel %vm580_vm8, %v1156_v60, 4 }
 0x36d   : > { %v455_v20 = vmul.f32 1.442695, %v453_v18  ;;  %v584_v21 = vsel %vm343_vm4, %v582_v19, 2147483647 }
 0x36e   : > { %v1236_v23 = vpop.xlane.xlu1 %451  ;;  %v586_v24 = vshra.s32 %v584_v21, 16  ;;  %v585_v34 = vand.u32 65535, %v584_v21 }
 0x36f   : > { %v454_v25 = vsub.f32 %v446_v12, %v1236_v23  ;;  %vm581_vm9 = vcmp.eq.f32.partialorder %v446_v12, %v1236_v23  ;;  %864 = vpow2.f32 %v455_v20  ;;  %v519_v51 = vpop.xlane.xlu0 %518  ;;  %v473_v20 = vadd.f32 %v471_v9, %v1219_v4 }
 0x370   : > { %v588_v26 = vcvt.s32.f32 %v586_v24  ;;  %v583_v27 = vsel %vm581_vm9, %v1156_v60, 4  ;;  %v587_v47 = vcvt.s32.f32 %v585_v34  ;;  %v763_v56 = vmul.f32 -1.442695, %v519_v51 }
 0x371   : > { %v457_v28 = vmul.f32 1.442695, %v454_v25  ;;  %v599_v29 = vsel %vm343_vm4, %v583_v27, 2147483647 }
 0x372   : > { %589 = vmin.xlane.f32.xlu1 %v588_v26  ;;  %v601_v30 = vshra.s32 %v599_v29, 16  ;;  %v600_v49 = vand.u32 65535, %v599_v29 }
 0x373   : > { %866 = vpow2.f32 %v457_v28 }
 0x374   : > { %v603_v36 = vcvt.s32.f32 %v601_v30  ;;  %868 = vpow2.f32 %v760_v45  ;;  %v602_v54 = vcvt.s32.f32 %v600_v49 }
 0x375   : > { %870 = vpow2.f32 %v761_v50 }
 0x376   : > { %604 = vmin.xlane.f32.xlu1 %v603_v36  ;;  %872 = vpow2.f32 %v763_v56 }
 0x379   : > { %v865_v39 = vpop.eup %864 }
 0x37a   : > { %515 = vmax.xlane.f32.xlu1 %v514_v38  ;;  %v459_v32 = vsel %vm343_vm4, %v865_v39, 0.0 }
 0x37d   : > { %v867_v40 = vpop.eup %866 }
 0x37e   : > { %460 = vadd.xlane.f32.xlu1 %v459_v32  ;;  %v462_v41 = vsel %vm343_vm4, %v867_v40, 0.0  ;;  %v869_v3 = vpop.eup %868 }
 0x37f   : > { %463 = vadd.xlane.f32.xlu0 %v462_v41  ;;  %v871_v5 = vpop.eup %870  ;;  %v530_v63 = vadd.f32 1.0, %v869_v3  ;;  %v1008_v41 = vmov 0.0  }
 0x380   : > { %v873_v6 = vpop.eup %872  ;;  %v531_v7 = vadd.f32 1.0, %v871_v5 }
 0x381   : > { %v545_v11 = vadd.f32 1.0, %v873_v6 }
 0x3ff   : > { %v590_v46 = vpop.xlane.xlu1 %589 }
 0x400   : > { %vm591_vm10 = vcmp.eq.f32.partialorder %v588_v26, %v590_v46 }
 0x401   : > { %v592_v52 = vsel %vm591_vm10, %v587_v47, inf }
 0x402   : > { %593 = vmin.xlane.f32.xlu1 %v592_v52 }
 0x403   : > { %v605_v53 = vpop.xlane.xlu1 %604 }
 0x404   : > { %vm606_vm11 = vcmp.eq.f32.partialorder %v603_v36, %v605_v53 }
 0x405   : > { %v607_v57 = vsel %vm606_vm11, %v602_v54, inf }
 0x406   : > { %608 = vmin.xlane.f32.xlu0 %v607_v57 }
 0x407   : > { %v516_v58 = vpop.xlane.xlu1 %515 }
 0x408   : > { %v762_v1 = vmul.f32 -1.442695, %v516_v58 }
 0x40a   : > { %874 = vpow2.f32 %v762_v1 }
 0x40b   : > { %v461_v2 = vpop.xlane.xlu1 %460 }
 0x40c   : > { %876 = vlog2.f32 %v461_v2  ;;  %v464_v0 = vpop.xlane.xlu0 %463 }
 0x40d   : > { %878 = vlog2.f32 %v464_v0 }
 0x40e   : > { %880 = vrcp.f32 %v530_v63 }
 0x40f   : > { %882 = vrcp.f32 %v531_v7 }
 0x414   : > { %v875_v8 = vpop.eup %874 }
 0x415   : > { %v544_v12 = vadd.f32 1.0, %v875_v8 }
 0x416   : > { %v877_v13 = vpop.eup %876 }
 0x417   : > { %v879_v15 = vpop.eup %878  ;;  %884 = vrcp.f32 %v544_v12  ;;  %v466_v16 = vmul.f32 0.6931472, %v877_v13 }
 0x418   : > { %v468_v18 = vmul.f32 0.6931472, %v879_v15  ;;  %886 = vrcp.f32 %v545_v11  ;;  %v881_v25 = vpop.eup %880 }
 0x419   : > { %v469_v19 = vadd.f32 %v466_v16, %v1230_v17  ;;  %v883_v48 = vpop.eup %882  ;;  %v536_v59 = vsub.f32 1.0, %v881_v25  ;;  %v596_v17 = vcvt.f32.s32 %v590_v46 }
 0x41a   : > { %v470_v21 = vadd.f32 %v468_v18, %v1236_v23  ;;  %v537_v29 = vsub.f32 1.0, %v883_v48  ;;  %v611_v23 = vcvt.f32.s32 %v605_v53 }
 0x41b   : > { %v475_v22 = vsub.f32 %v469_v19, %v473_v20  ;;  %v597_v36 = vshll.u32 %v596_v17, 16 }
 0x41c   : > { %v476_v24 = vsub.f32 %v470_v21, %v474_v35  ;;  %v612_v39 = vshll.u32 %v611_v23, 16 }
 0x41d   : > { %480 = vperm.xlu1 %850, %v475_v22  }
 0x41e   : > { %483 = vperm.xlu0 %849, %v476_v24  }
 0x421   : > { %v885_v26 = vpop.eup %884 }
 0x422   : > { %v550_v27 = vadd.f32 %v885_v26, %v536_v59  ;;  %v887_v28 = vpop.eup %886 }
 0x423   : > { %v551_v30 = vadd.f32 %v887_v28, %v537_v29 }
 0x424   : > { %555 = vperm.xlu1 %850, %v550_v27  }
 0x428   : > { %558 = vperm.xlu1 %850, %v551_v30  }
 0x48f   : > { %v594_v31 = vpop.xlane.xlu1 %593 }
 0x490   : > { %v595_v37 = vcvt.f32.s32 %v594_v31 }
 0x492   : > { %v598_v4 = vadd.s32 %v597_v36, %v595_v37 }
 0x493   : > { %v609_v38 = vpop.xlane.xlu0 %608 }
 0x494   : > { %v610_v40 = vcvt.f32.s32 %v609_v38  ;;  %vm614_vm12 = vcmp.eq.s32.totalorder %v598_v4, %v1158_v61 }
 0x495   : > { %v764_v33 = vsel %vm614_vm12, 1.0, %v1008_v41 }
 0x496   : > { %v613_v32 = vadd.s32 %v612_v39, %v610_v40 }
 0x498   : > { %vm615_vm13 = vcmp.eq.s32.totalorder %v613_v32, %v1160_v62 }
 0x499   : > { %v765_v42 = vsel %vm615_vm13, 1.0, %v1008_v41 }
 0x49a   : > { %v851_v43 = vpack.i.bf16 %v765_v42, %v764_v33 }
 0x49c   : > { %v481_v34 = vpop.permute.xlu1 %480  ;;  %852 = vperm.xlu1 %850, %v851_v43  }
 0x49d   : > { %v488_v44 = vrot.slane %v481_v34, %v1182_v10  ;;  %v484_v45 = vpop.permute.xlu0 %483 }
 0x49e   : > { %v492_v46 = vrot.slane %v484_v45, %v1182_v10 }
 0x4a0   : > { %v493_v47 = vsel %vm200_vm0, %v492_v46, %v488_v44 }
 0x4a1   : > { %v496_v49 = vsel %vm495_vm14, %v493_v47, 0.0 }
 0x4a2   : > { %497 = vadd.xlane.f32.xlu0 %v496_v49 }
 0x4a3   : > { %v556_v61 = vpop.permute.xlu1 %555 }
 0x4a4   : > { %v563_v51 = vrot.slane %v556_v61, %v1182_v10 }
 0x4a7   : > { %v559_v50 = vpop.permute.xlu1 %558 }
 0x4a8   : > { %v567_v62 = vrot.slane %v559_v50, %v1182_v10 }
 0x4aa   : > { %v568_v52 = vsel %vm200_vm0, %v567_v62, %v563_v51 }
 0x4ab   : > { %v570_v53 = vsel %vm495_vm14, %v568_v52, 0.0 }
 0x4c0   : > { %571 = vadd.xlane.f32.xlu1 %v570_v53 }
 0x51b   : > { %v853_v54 = vpop.permute.xlu1 %852 }
 0x51c   : > { %v855_v56 = vunpack.i.h.bf16 %v853_v54  ;;  %v854_v57 = vunpack.i.l.bf16 %v853_v54 }
 0x51e   : > { %v635_v58 = vrot.slane %v855_v56, %v1182_v10  ;;  %v631_v1 = vrot.slane %v854_v57, %v1182_v10 }
 0x520   : > { %v636_v2 = vsel %vm200_vm0, %v635_v58, %v631_v1  ;;  %vm649_vm0 = vcmp.eq.s32.totalorder %v1156_v60, 1 }
 0x521   : > { %v638_v3 = vsel %vm495_vm14, %v636_v2, 0.0 }
 0x522   : > { %639 = vadd.xlane.f32.xlu0 %v638_v3 }
 0x52f   : > { %v498_v0 = vpop.xlane.xlu0 %497 }
 0x530   : > { %v499_v5 = vrot.slane %v498_v0, 4 }
 0x532   : > { %v500_v63 = vadd.f32 %v499_v5, %v498_v0 }
 0x534   : > { %v501_v6 = vrot.slane %v500_v63, 2 }
 0x536   : > { %v502_v7 = vadd.f32 %v501_v6, %v500_v63 }
 0x538   : > { %v503_v8 = vrot.slane %v502_v7, 1 }
 0x53a   : > { %v504_v9 = vadd.f32 %v503_v8, %v502_v7 }
 0x53c   : > { %779 = vpush %v504_v9 }
 0x54d   : > { %v572_v11 = vpop.xlane.xlu1 %571 }
 0x54e   : > { %v573_v12 = vrot.slane %v572_v11, 4 }
 0x550   : > { %v574_v13 = vadd.f32 %v573_v12, %v572_v11 }
 0x552   : > { %v575_v14 = vrot.slane %v574_v13, 2 }
 0x554   : > { %v576_v15 = vadd.f32 %v575_v14, %v574_v13 }
 0x556   : > { %v577_v10 = vrot.slane %v576_v15, 1 }
 0x558   : > { %v578_v16 = vadd.f32 %v577_v10, %v576_v15 }
 0x55a   : > { %781 = vpush %v578_v16 }
 0x56d   : > { %s780_s4 = spop %779 }
 0x56e   : > { %v655_v26 = vstv %s780_s4 }
 0x58b   : > { %s782_s5 = spop %781 }
 0x58c   : > { %v653_v48 = vstv %s782_s5 }
 0x5af   : > { %v640_v18 = vpop.xlane.xlu0 %639 }
 0x5b0   : > { %v641_v19 = vrot.slane %v640_v18, 4 }
 0x5b2   : > { %v642_v20 = vadd.f32 %v641_v19, %v640_v18 }
 0x5b4   : > { %v643_v21 = vrot.slane %v642_v20, 2 }
 0x5b6   : > { %v644_v35 = vadd.f32 %v643_v21, %v642_v20 }
 0x5b8   : > { %v645_v22 = vrot.slane %v644_v35, 1 }
 0x5ba   : > { %v646_v24 = vadd.f32 %v645_v22, %v644_v35 }
 0x5bc   : > { %783 = vpush %v646_v24 }
 0x5ed   : > { %s784_s6 = spop %783 }
 0x5ee   : > { %v651_v25 = vstv %s784_s6 }
 0x5ef   : > { %v652_v59 = vsel %vm650_vm15, %v651_v25, 0.0 }
 0x5f0   : > { %v654_v27 = vsel %vm649_vm0, %v653_v48, %v652_v59 }
 0x5f1   : > { %v656_v28 = vsel %vm648_vm1, %v655_v26, %v654_v27 }
 0x5f2   : > { %v658_v60 = vsel %vm657_vm2, %v656_v28, 0.0 }
 0x5f3   : > { %659 = vst [vmem:[%s150_s8] sm:$0xff] %v658_v60 }
 0x5f4   : > { %944 = shalt.err (!%p941_p10)
}
 0x5f5   : > { %s945_s26 = scalar_lea.hbm %s1281_s22, 128  ;;  %s949_s29 = scalar_lea.hbm %s1325_s2, 256 }
 0x5f6   : > { %p946_p2 = scmp.ne.s32.totalorder %s1281_s22, %s945_s26  ;;  %p950_p0 = scmp.lt.u32.totalorder %s1281_s22, %s1325_s2 }
 0x5f7   : > { %p951_p7 = scmp.lt.u32.totalorder %s949_s29, %s945_s26  ;;  %p953_p12 = scmp.lt.u32.totalorder %s945_s26, %s1281_s22 }
 0x5f8   : > { %p947_p3 = pnand %p946_p2, %p1338_p11 }
 0x5f9   : > { %p952_p8 = por %p951_p7, %p950_p0 }
 0x5fa   : > { %p948_p4 = pneg %p947_p3 }
 0x5fb   : > { %p954_p13 = por %p953_p12, %p952_p8 }
 0x5fd   : > { %p955_p1 = pnand %p954_p13, %p948_p4 }
 0x5ff   : > { %958 = shalt.err (!%p955_p1)
}
 0x600   : > { %793 = dma.vmem_to_hbm [thread:$0]  (%p1338_p11), %s1283_s14, 128, %s1281_s22, %s661_s13  }
 0x601 PF: > { %p810_p6 = scmp.ge.s32.totalorder %s1001_s12, 2  ;;  %s686_s4 = sand.u32 1, %s989_s9  }
 0x602   : > { %p1339_p5 = scmp.ne.s32.totalorder %s1330_s20, 0  ;;  %s687_s5 = scalar_lea.sflag [#allocation4], %s686_s4 }
 0x604   : > { %p803_p9 = pnand %p810_p6, %p1339_p5 }
 0x606   : > { %984 = dma.done.wait (!%p803_p9), %s687_s5, 128  }
 0x607   : > { %986 = vsyncadd (!%p803_p9), %s687_s5, 4294967168  ;;  %p14_p10 = scmp.ge.s32.totalorder %s1050_s15, 4   ;;  %s1340_s9 = smov %s993_s10 }
 0x608   : > { %s1341_s10 = smov %s997_s11  ;;  %s1342_s11 = smov %s1061_s18 }
 0x609   : > { %s1343_s12 = smov %s1050_s15  ;;  %16 = sbr.rel (!%p14_p10) target bundleno = 5 (0x5), region = 71 }
 0x610   :  { %692 = vsyncpa [#allocation3], 1 }
 0x611   :  { %694 = vsyncpa [#allocation3 + $0x1], 1 }
 0x612   :  { %695 = vsyncpa [#allocation4], 1 }
 0x613   :  { %697 = vsyncpa [#allocation4 + $0x1], 1 }
 0x614   :  { %698 = vsyncpa [#allocation5], 1 }
 0x615   :  { %700 = vsyncpa [#allocation5 + $0x1], 1 }

</bundles_post_ra>
